<compile_context>
chip_gen: v5e
topology: v5e:2x2
jax: 0.10.0
libtpu: 0.0.40
codegen_flags: <defaults>
</compile_context>

<pallas_src>
import jax
import jax.numpy as jnp
from jax.experimental import pallas as pl
from jax.experimental.pallas import tpu as pltpu

LANE = 128            # hidden features are zero-padded to this lane width
SUBLANE = 8           # batch tiles must be sublane (8) aligned
MAX_TILE_B = 2048     # cap rows per grid step (keeps double-buffered VMEM small)
TWO_STEP_MIN_B = 256  # below this, a single grid step is cheapest on all chips


def _silu(x):
    # SiLU(x) = x * sigmoid(x), with sigmoid(x) = 0.5 * (tanh(x/2) + 1):
    # a single EUP tanh push (vs exp + reciprocal), no inf intermediate for
    # large |x|, and ~1e-6 agreement with the reference.
    return x * (0.5 * jnp.tanh(0.5 * x) + 0.5)


def odefunc_kernel(t_ref, w1_ref, b1_ref, w2_ref, b2_ref, w3_ref, b3_ref, o_ref):
    # Layer 1: Linear(1 -> H).  K == 1, so skip the MXU (which would pad K up
    # to its native 128/256 and waste the systolic array) and use a VPU
    # broadcast outer product: (TB, 1) * (1, HP) + (1, HP).
    x = t_ref[...] * w1_ref[...] + b1_ref[...]
    x = _silu(x)
    # Layer 2: Linear(H -> H) on the MXU (128-lane aligned via zero padding).
    x = jnp.dot(x, w2_ref[...], preferred_element_type=jnp.float32) + b2_ref[...]
    x = _silu(x)
    # Layer 3: Linear(H -> O).  Output keeps its true width O (no lane pad):
    # HBM writeback stays minimal and only an in-register mask is paid.
    x = jnp.dot(x, w3_ref[...], preferred_element_type=jnp.float32) + b3_ref[...]
    o_ref[...] = x.astype(o_ref.dtype)


def _pad_to(a, shape):
    return jnp.pad(a, [(0, s - d) for s, d in zip(shape, a.shape)])


def prepare_params(params):
    """Pad weights ONCE, outside the per-call hot path.

    Hidden features are zero-padded to a 128-lane multiple.  Zero padding is
    semantics-preserving ONLY because the biases are zero-padded too: padded
    hidden columns then stay exactly 0 through SiLU and contribute nothing to
    the following matmuls.  The output width O is intentionally NOT padded.
    """
    w1, b1 = params["w1"], params["b1"]
    w2, b2 = params["w2"], params["b2"]
    w3, b3 = params["w3"], params["b3"]
    H = w1.shape[1]
    O = w3.shape[1]
    HP = pl.cdiv(H, LANE) * LANE
    return {
        "w1": _pad_to(w1, (1, HP)), "b1": _pad_to(b1, (1, HP)),
        "w2": _pad_to(w2, (HP, HP)), "b2": _pad_to(b2, (1, HP)),
        "w3": _pad_to(w3, (HP, O)), "b3": _pad_to(b3, (1, O)),
    }


def _choose_tiling(B):
    """Return (BP, tile_b, nb): fewest big grid steps.

    Small batches -> a single step (no per-step overhead; ideal for single-TC
    v5e/v6e).  Larger batches -> an even number of steps (>= 2) so the
    "parallel" axis shards one slab per TensorCore on v7x, with tiles capped
    at MAX_TILE_B rows and kept sublane (8) aligned.
    """
    if B < TWO_STEP_MIN_B:
        BP = pl.cdiv(B, SUBLANE) * SUBLANE
        return BP, BP, 1
    nb = max(2, pl.cdiv(B, MAX_TILE_B))
    nb += nb % 2                                     # even step count for v7x
    tile_b = pl.cdiv(pl.cdiv(B, nb), SUBLANE) * SUBLANE
    return nb * tile_b, tile_b, nb


@jax.jit
def odefunc_forward(t, padded_params):
    """ODEFunc.forward.  t: (B, 1) f32 time points -> (B, O) f32.

    `padded_params` must come from prepare_params() (weight padding is hoisted
    out of this hot path; only t is padded here, and only when needed).
    """
    w1p, b1p = padded_params["w1"], padded_params["b1"]
    w2p, b2p = padded_params["w2"], padded_params["b2"]
    w3p, b3p = padded_params["w3"], padded_params["b3"]

    B = t.shape[0]
    O = w3p.shape[1]
    BP, tile_b, nb = _choose_tiling(B)          # shapes are static under jit
    tp = _pad_to(t, (BP, 1)) if BP != B else t

    # Constant index_map: weights/biases are DMA'd into VMEM once and stay
    # resident across all grid steps.
    const = lambda a: pl.BlockSpec(a.shape, lambda i: (0, 0))

    out = pl.pallas_call(
        odefunc_kernel,
        out_shape=jax.ShapeDtypeStruct((BP, O), jnp.float32),
        grid=(nb,),
        in_specs=[
            pl.BlockSpec((tile_b, 1), lambda i: (i, 0)),   # t: streamed
            const(w1p), const(b1p),
            const(w2p), const(b2p),
            const(w3p), const(b3p),
        ],
        out_specs=pl.BlockSpec((tile_b, O), lambda i: (i, 0)),
        compiler_params=pltpu.CompilerParams(
            # Independent batch slabs -> shard across both TensorCores on v7x;
            # measured no-op on single-TC v5e/v6e.
            dimension_semantics=("parallel",)),
    )(tp, w1p, b1p, w2p, b2p, w3p, b3p)

    return out[:B] if BP != B else out


def init_params(key, hidden_dim, output_dim):
    """Deterministic init mirroring nn.Linear's U(-1/sqrt(fan_in), 1/sqrt(fan_in))."""
    ks = jax.random.split(key, 6)

    def lin(kw, kb, fan_in, fan_out):
        bound = 1.0 / jnp.sqrt(jnp.float32(fan_in))
        w = jax.random.uniform(kw, (fan_in, fan_out), jnp.float32, -bound, bound)
        b = jax.random.uniform(kb, (1, fan_out), jnp.float32, -bound, bound)
        return w, b

    w1, b1 = lin(ks[0], ks[1], 1, hidden_dim)
    w2, b2 = lin(ks[2], ks[3], hidden_dim, hidden_dim)
    w3, b3 = lin(ks[4], ks[5], hidden_dim, output_dim)
    return {"w1": w1, "b1": b1, "w2": w2, "b2": b2, "w3": w3, "b3": b3}


def odefunc_reference(t, params):
    x = t @ params["w1"] + params["b1"]
    x = x * jax.nn.sigmoid(x)
    x = x @ params["w2"] + params["b2"]
    x = x * jax.nn.sigmoid(x)
    return x @ params["w3"] + params["b3"]


if __name__ == "__main__":
    key = jax.random.PRNGKey(0)
    k_param, k_t, k_t_small = jax.random.split(key, 3)

    hidden_dim = 32
    output_dim = 8
    # ODE-solver use case: many time points per launch; B=256 runs as two
    # 128-row slabs (one per v7x TensorCore) in a single pallas_call.
    batch = 256

    params = init_params(k_param, hidden_dim, output_dim)
    padded = prepare_params(params)   # one-time padding, outside the hot path

    t = jax.random.uniform(k_t, (batch, 1), jnp.float32, 0.0, 1.0)
    out = jax.block_until_ready(odefunc_forward(t, padded))
    ref = odefunc_reference(t, params)
    assert out.shape == (batch, output_dim)
    err = float(jnp.max(jnp.abs(out - ref)))
    assert jnp.allclose(out, ref, atol=1e-5, rtol=1e-4), f"mismatch, max err {err}"

    # Also exercise the small-batch (single grid step) tiling path.
    t_small = jax.random.uniform(k_t_small, (2, 1), jnp.float32, 0.0, 1.0)
    out_small = jax.block_until_ready(odefunc_forward(t_small, padded))
    ref_small = odefunc_reference(t_small, params)
    assert out_small.shape == (2, output_dim)
    err_small = float(jnp.max(jnp.abs(out_small - ref_small)))
    assert jnp.allclose(out_small, ref_small, atol=1e-5, rtol=1e-4), (
        f"small-batch mismatch, max err {err_small}")

    print("KERNEL_OK")
</pallas_src>

<mosaic_0001>
module attributes {stable_mosaic.version = 11 : i64} {
  func.func @odefunc_kernel(%arg0: i32, %arg1: memref<128x1xf32, #tpu.memory_space<vmem>>, %arg2: memref<1x128xf32, #tpu.memory_space<vmem>>, %arg3: memref<1x128xf32, #tpu.memory_space<vmem>>, %arg4: memref<128x128xf32, #tpu.memory_space<vmem>>, %arg5: memref<1x128xf32, #tpu.memory_space<vmem>>, %arg6: memref<128x8xf32, #tpu.memory_space<vmem>>, %arg7: memref<1x8xf32, #tpu.memory_space<vmem>>, %arg8: memref<128x8xf32, #tpu.memory_space<vmem>>) attributes {dimension_semantics = [#tpu.dimension_semantics<parallel>], iteration_bounds = array<i64: 2>, scalar_prefetch = 0 : i64, scratch_operands = 0 : i64, tpu.core_type = #tpu.core_type<tc>, window_params = [{transform_indices = @transform_0, window_bounds = array<i64: 128, 1>}, {pipeline_mode = #tpu.pipeline_mode<synchronous>, transform_indices = @transform_1, window_bounds = array<i64: 1, 128>}, {pipeline_mode = #tpu.pipeline_mode<synchronous>, transform_indices = @transform_2, window_bounds = array<i64: 1, 128>}, {pipeline_mode = #tpu.pipeline_mode<synchronous>, transform_indices = @transform_3, window_bounds = array<i64: 128, 128>}, {pipeline_mode = #tpu.pipeline_mode<synchronous>, transform_indices = @transform_4, window_bounds = array<i64: 1, 128>}, {pipeline_mode = #tpu.pipeline_mode<synchronous>, transform_indices = @transform_5, window_bounds = array<i64: 128, 8>}, {pipeline_mode = #tpu.pipeline_mode<synchronous>, transform_indices = @transform_6, window_bounds = array<i64: 1, 8>}, {transform_indices = @transform_7, window_bounds = array<i64: 128, 8>}]} {
    %c0 = arith.constant 0 : index
    %c0_0 = arith.constant 0 : index
    %0 = vector.load %arg1[%c0, %c0_0] : memref<128x1xf32, #tpu.memory_space<vmem>>, vector<128x1xf32>
    %c0_1 = arith.constant 0 : index
    %c0_2 = arith.constant 0 : index
    %1 = vector.load %arg2[%c0_1, %c0_2] : memref<1x128xf32, #tpu.memory_space<vmem>>, vector<1x128xf32>
    %2 = vector.broadcast %0 : vector<128x1xf32> to vector<128x128xf32>
    %3 = vector.broadcast %1 : vector<1x128xf32> to vector<128x128xf32>
    %4 = arith.mulf %2, %3 : vector<128x128xf32>
    %c0_3 = arith.constant 0 : index
    %c0_4 = arith.constant 0 : index
    %5 = vector.load %arg3[%c0_3, %c0_4] : memref<1x128xf32, #tpu.memory_space<vmem>>, vector<1x128xf32>
    %6 = vector.broadcast %5 : vector<1x128xf32> to vector<128x128xf32>
    %7 = arith.addf %4, %6 : vector<128x128xf32>
    %cst = arith.constant 5.000000e-01 : f32
    %8 = vector.broadcast %cst : f32 to vector<128x128xf32>
    %9 = arith.mulf %8, %7 : vector<128x128xf32>
    %10 = math.tanh %9 : vector<128x128xf32>
    %cst_5 = arith.constant 5.000000e-01 : f32
    %11 = vector.broadcast %cst_5 : f32 to vector<128x128xf32>
    %12 = arith.mulf %11, %10 : vector<128x128xf32>
    %cst_6 = arith.constant 5.000000e-01 : f32
    %13 = vector.broadcast %cst_6 : f32 to vector<128x128xf32>
    %14 = arith.addf %12, %13 : vector<128x128xf32>
    %15 = arith.mulf %7, %14 : vector<128x128xf32>
    %c0_7 = arith.constant 0 : index
    %c0_8 = arith.constant 0 : index
    %16 = vector.load %arg4[%c0_7, %c0_8] : memref<128x128xf32, #tpu.memory_space<vmem>>, vector<128x128xf32>
    %cst_9 = arith.constant dense<0.000000e+00> : vector<128x128xf32>
    %17 = tpu.matmul %15, %16, %cst_9 {dimension_numbers = #tpu.dot_dimension_numbers<[1], [0], [0], [1], [0, 0, 1, 1], [], []>} : vector<128x128xf32>, vector<128x128xf32>, vector<128x128xf32> -> vector<128x128xf32>
    %c0_10 = arith.constant 0 : index
    %c0_11 = arith.constant 0 : index
    %18 = vector.load %arg5[%c0_10, %c0_11] : memref<1x128xf32, #tpu.memory_space<vmem>>, vector<1x128xf32>
    %19 = vector.broadcast %18 : vector<1x128xf32> to vector<128x128xf32>
    %20 = arith.addf %17, %19 : vector<128x128xf32>
    %cst_12 = arith.constant 5.000000e-01 : f32
    %21 = vector.broadcast %cst_12 : f32 to vector<128x128xf32>
    %22 = arith.mulf %21, %20 : vector<128x128xf32>
    %23 = math.tanh %22 : vector<128x128xf32>
    %cst_13 = arith.constant 5.000000e-01 : f32
    %24 = vector.broadcast %cst_13 : f32 to vector<128x128xf32>
    %25 = arith.mulf %24, %23 : vector<128x128xf32>
    %cst_14 = arith.constant 5.000000e-01 : f32
    %26 = vector.broadcast %cst_14 : f32 to vector<128x128xf32>
    %27 = arith.addf %25, %26 : vector<128x128xf32>
    %28 = arith.mulf %20, %27 : vector<128x128xf32>
    %c0_15 = arith.constant 0 : index
    %c0_16 = arith.constant 0 : index
    %29 = vector.load %arg6[%c0_15, %c0_16] : memref<128x8xf32, #tpu.memory_space<vmem>>, vector<128x8xf32>
    %cst_17 = arith.constant dense<0.000000e+00> : vector<128x8xf32>
    %30 = tpu.matmul %28, %29, %cst_17 {dimension_numbers = #tpu.dot_dimension_numbers<[1], [0], [0], [1], [0, 0, 1, 1], [], []>} : vector<128x128xf32>, vector<128x8xf32>, vector<128x8xf32> -> vector<128x8xf32>
    %c0_18 = arith.constant 0 : index
    %c0_19 = arith.constant 0 : index
    %31 = vector.load %arg7[%c0_18, %c0_19] : memref<1x8xf32, #tpu.memory_space<vmem>>, vector<1x8xf32>
    %32 = vector.broadcast %31 : vector<1x8xf32> to vector<128x8xf32>
    %33 = arith.addf %30, %32 : vector<128x8xf32>
    %c0_20 = arith.constant 0 : index
    %c0_21 = arith.constant 0 : index
    %34 = vector.load %arg8[%c0_20, %c0_21] : memref<128x8xf32, #tpu.memory_space<vmem>>, vector<128x8xf32>
    tpu.vector_store %arg8[%c0_20, %c0_21], %33 {strides = array<i32>} : memref<128x8xf32, #tpu.memory_space<vmem>>, vector<128x8xf32>,
    return
  }
  func.func @transform_0(%arg0: i32) -> (i32, i32) {
    %c0_i32 = arith.constant 0 : i32
    %c0_i32_0 = arith.constant 0 : i32
    return %arg0, %c0_i32 : i32, i32
  }
  func.func @transform_1(%arg0: i32) -> (i32, i32) {
    %c0_i32 = arith.constant 0 : i32
    %c0_i32_0 = arith.constant 0 : i32
    %c0_i32_1 = arith.constant 0 : i32
    return %c0_i32, %c0_i32_0 : i32, i32
  }
  func.func @transform_2(%arg0: i32) -> (i32, i32) {
    %c0_i32 = arith.constant 0 : i32
    %c0_i32_0 = arith.constant 0 : i32
    %c0_i32_1 = arith.constant 0 : i32
    return %c0_i32, %c0_i32_0 : i32, i32
  }
  func.func @transform_3(%arg0: i32) -> (i32, i32) {
    %c0_i32 = arith.constant 0 : i32
    %c0_i32_0 = arith.constant 0 : i32
    %c0_i32_1 = arith.constant 0 : i32
    return %c0_i32, %c0_i32_0 : i32, i32
  }
  func.func @transform_4(%arg0: i32) -> (i32, i32) {
    %c0_i32 = arith.constant 0 : i32
    %c0_i32_0 = arith.constant 0 : i32
    %c0_i32_1 = arith.constant 0 : i32
    return %c0_i32, %c0_i32_0 : i32, i32
  }
  func.func @transform_5(%arg0: i32) -> (i32, i32) {
    %c0_i32 = arith.constant 0 : i32
    %c0_i32_0 = arith.constant 0 : i32
    %c0_i32_1 = arith.constant 0 : i32
    return %c0_i32, %c0_i32_0 : i32, i32
  }
  func.func @transform_6(%arg0: i32) -> (i32, i32) {
    %c0_i32 = arith.constant 0 : i32
    %c0_i32_0 = arith.constant 0 : i32
    %c0_i32_1 = arith.constant 0 : i32
    return %c0_i32, %c0_i32_0 : i32, i32
  }
  func.func @transform_7(%arg0: i32) -> (i32, i32) {
    %c0_i32 = arith.constant 0 : i32
    %c0_i32_0 = arith.constant 0 : i32
    return %arg0, %c0_i32 : i32, i32
  }
}

</mosaic_0001>

<bundles_post_ra>
// kernel: odefunc_forward.1
= control target key start
LH: loop header
LB: loop body
LE: loop exit
PB: predicated region body
PF: predicated region fallthrough
CT: control target
= control target key end

     0   :  { %s993_s24 = smov 0   ;;  %s1267_s0 = inlined_call_operand.vmem [shape: f32[256,1], index: 0, kind: input, shape index: {}]   ;;  %s1268_s1 = inlined_call_operand.vmem [shape: f32[1,128], index: 1, kind: input, shape index: {}]   ;;  %s1269_s2 = inlined_call_operand.vmem [shape: f32[1,128], index: 2, kind: input, shape index: {}]   ;;  %s1270_s3 = inlined_call_operand.vmem [shape: f32[128,128], index: 3, kind: input, shape index: {}]   ;;  %s1271_s4 = inlined_call_operand.vmem [shape: f32[1,128], index: 4, kind: input, shape index: {}]   ;;  %s1272_s5 = inlined_call_operand.vmem [shape: f32[128,8], index: 5, kind: input, shape index: {}]   ;;  %s1273_s6 = inlined_call_operand.vmem [shape: f32[1,8], index: 6, kind: input, shape index: {}]   ;;  %s1274_s7 = inlined_call_operand.vmem [shape: f32[256,8], index: 7, kind: output, shape index: {}]  }
   0x1 LB: > { %s821_s25 = sadd.s32 4294967295, %s950_s24   ;;  %p825_p0 = scmp.ge.s32.totalorder %s950_s24, 1  ;;  %s950_s24 = sphi %s993_s24, %s17_s24  }
   0x2   : > { %p238_p1 = scmp.lt.s32.totalorder %s950_s24, 3 }
   0x4   : > { %p239_p2 = pnand %p825_p0, %p238_p1 }
   0x5   : > { %s826_s26 = sshll.u32 (!%p239_p2), %s821_s25, 4 }
   0x6   : > { %242 = sbr.rel (%p239_p2) target bundleno = 489 (0x1e9), region = 48  ;;  %p271_p3 = scmp.lt.s32.totalorder (!%p239_p2), %s826_s26, 31 }
   0xb   : > { %v952_v0 = vmov 0   ;;  %s1276_s26 = smov (!%p271_p3, %s826_s26), 31  ;;  %v513_v17 = vld [vmem:[%s1270_s3 + $0x78] sm:$0xff]  ;;  %v512_v18 = vld [vmem:[%s1270_s3 + $0x70] sm:$0xff]  ;;  %v511_v19 = vld [vmem:[%s1270_s3 + $0x68] sm:$0xff]  ;;  %vm748_vm0 = vcmask 64512  }
   0xc   : > { %875 = vset.pattern.permute.xlu2 %v952_v0  ;;  %874 = vset.pattern.permute.xlu1 %v952_v0  ;;  %s827_s27 = sshll.u32 %s1276_s26, 3  ;;  %v510_v20 = vld [vmem:[%s1270_s3 + $0x60] sm:$0xff]  ;;  %v509_v21 = vld [vmem:[%s1270_s3 + $0x58] sm:$0xff]  ;;  %v508_v22 = vld [vmem:[%s1270_s3 + $0x50] sm:$0xff] }
   0xd   : > { %873 = vset.pattern.permute.xlu0 %v952_v0  ;;  %s1009_s30 = scalar_lea.vmem %s1267_s0, %s827_s27  ;;  %518 = vmatpush.msra.mxu0 %v513_v17  ;;  %v507_v23 = vld [vmem:[%s1270_s3 + $0x48] sm:$0xff]  ;;  %v506_v24 = vld [vmem:[%s1270_s3 + $0x40] sm:$0xff]  ;;  %v505_v25 = vld [vmem:[%s1270_s3 + $0x38] sm:$0xff]  ;;  %s1230_s22 = scalar_lea.vmem %s1274_s7, %s827_s27 }
   0xe   : > { %v290_v1 = vld [vmem:[%s1009_s30 + $0x40] sm:$0xff]  ;;  %v283_v2 = vld [vmem:[%s1009_s30 + $0x8] sm:$0xff]  ;;  %v293_v5 = vld [vmem:[%s1009_s30 + $0x58] sm:$0xff]  ;;  %832 = vmatpush.msra.mxu2 %v513_v17 }
   0xf   : > { %v282_v3 = vld [vmem:[%s1009_s30] sm:$0xff]  ;;  %341 = vperm.xlu0 %873, %v290_v1   ;;  %306 = vperm.xlu2 %875, %v283_v2   ;;  %v291_v4 = vld [vmem:[%s1009_s30 + $0x48] sm:$0xff]  ;;  %v292_v6 = vld [vmem:[%s1009_s30 + $0x50] sm:$0xff] }
  0x10   : > { %301 = vperm.xlu1 %874, %v282_v3   ;;  %v284_v7 = vld [vmem:[%s1009_s30 + $0x10] sm:$0xff]  ;;  %v285_v8 = vld [vmem:[%s1009_s30 + $0x18] sm:$0xff]  ;;  %v294_v9 = vld [vmem:[%s1009_s30 + $0x60] sm:$0xff]  ;;  %519 = vmatpush.msra.mxu0 %v512_v18 }
  0x11   : > { %v295_v10 = vld [vmem:[%s1009_s30 + $0x68] sm:$0xff]  ;;  %v296_v11 = vld [vmem:[%s1009_s30 + $0x70] sm:$0xff]  ;;  %v286_v12 = vld [vmem:[%s1009_s30 + $0x20] sm:$0xff]  ;;  %833 = vmatpush.msra.mxu2 %v512_v18 }
  0x12   : > { %v287_v13 = vld [vmem:[%s1009_s30 + $0x28] sm:$0xff]  ;;  %v288_v14 = vld [vmem:[%s1009_s30 + $0x30] sm:$0xff]  ;;  %v297_v15 = vld [vmem:[%s1009_s30 + $0x78] sm:$0xff]  ;;  %520 = vmatpush.msra.mxu0 %v511_v19 }
  0x13   : > { %v289_v16 = vld [vmem:[%s1009_s30 + $0x38] sm:$0xff]  ;;  %834 = vmatpush.msra.mxu2 %v511_v19  ;;  %v504_v26 = vld [vmem:[%s1270_s3 + $0x30] sm:$0xff]  ;;  %v503_v27 = vld [vmem:[%s1270_s3 + $0x28] sm:$0xff] }
  0x14   : > { %521 = vmatpush.msra.mxu0 %v510_v20  ;;  %v502_v28 = vld [vmem:[%s1270_s3 + $0x20] sm:$0xff]  ;;  %v501_v29 = vld [vmem:[%s1270_s3 + $0x18] sm:$0xff]  ;;  %v500_v30 = vld [vmem:[%s1270_s3 + $0x10] sm:$0xff] }
  0x15   : > { %835 = vmatpush.msra.mxu2 %v510_v20  ;;  %v499_v31 = vld [vmem:[%s1270_s3 + $0x8] sm:$0xff]  ;;  %v498_v32 = vld [vmem:[%s1270_s3] sm:$0xff] }
  0x16   : > { %522 = vmatpush.msra.mxu0 %v509_v21  ;;  %v1078_v34 = vld [vmem:[%s1268_s1] ss:$0 sm:$0xff] }
  0x17   : > { %346 = vperm.xlu0 %873, %v291_v4   ;;  %356 = vperm.xlu2 %875, %v293_v5   ;;  %v1083_v35 = vld [vmem:[%s1269_s2] ss:$0 sm:$0xff] }
  0x18   : > { %351 = vperm.xlu1 %874, %v292_v6   ;;  %836 = vmatpush.msra.mxu2 %v509_v21 }
  0x19   : > { %523 = vmatpush.msra.mxu0 %v508_v22 }
  0x1a   : > { %837 = vmatpush.msra.mxu2 %v508_v22 }
  0x1b   : > { %524 = vmatpush.msra.mxu0 %v507_v23 }
  0x1c   : > { %838 = vmatpush.msra.mxu2 %v507_v23 }
  0x1d   : > { %525 = vmatpush.msra.mxu0 %v506_v24 }
  0x1e   : > { %839 = vmatpush.msra.mxu2 %v506_v24 }
  0x1f   : > { %311 = vperm.xlu0 %873, %v284_v7   ;;  %316 = vperm.xlu2 %875, %v285_v8  }
  0x20   : > { %361 = vperm.xlu1 %874, %v294_v9   ;;  %526 = vmatpush.msra.mxu0 %v505_v25 }
  0x21   : > { %840 = vmatpush.msra.mxu2 %v505_v25 }
  0x22   : > { %527 = vmatpush.msra.mxu0 %v504_v26 }
  0x23   : > { %841 = vmatpush.msra.mxu2 %v504_v26 }
  0x24   : > { %528 = vmatpush.msra.mxu0 %v503_v27 }
  0x25   : > { %842 = vmatpush.msra.mxu2 %v503_v27 }
  0x26   : > { %529 = vmatpush.msra.mxu0 %v502_v28 }
  0x27   : > { %366 = vperm.xlu0 %873, %v295_v10   ;;  %371 = vperm.xlu2 %875, %v296_v11  }
  0x28   : > { %321 = vperm.xlu1 %874, %v286_v12   ;;  %843 = vmatpush.msra.mxu2 %v502_v28 }
  0x29   : > { %530 = vmatpush.msra.mxu0 %v501_v29 }
  0x2a   : > { %844 = vmatpush.msra.mxu2 %v501_v29 }
  0x2b   : > { %531 = vmatpush.msra.mxu0 %v500_v30 }
  0x2c   : > { %845 = vmatpush.msra.mxu2 %v500_v30 }
  0x2d   : > { %532 = vmatpush.msra.mxu0 %v499_v31 }
  0x2e   : > { %846 = vmatpush.msra.mxu2 %v499_v31 }
  0x2f   : > { %326 = vperm.xlu0 %873, %v287_v13   ;;  %331 = vperm.xlu2 %875, %v288_v14  }
  0x30   : > { %376 = vperm.xlu1 %874, %v297_v15   ;;  %533 = vmatpush.msra.mxu0 %v498_v32 }
  0x31   : > { %847 = vmatpush.msra.mxu2 %v498_v32 }
  0x37   : > { %336 = vperm.xlu0 %873, %v289_v16  }
  0x69   : > { %v307_v33 = vpop.permute.xlu2 %306 }
  0x6a   : > { %v383_v36 = vmul.f32 %v1078_v34, %v307_v33 }
  0x6c   : > { %v403_v41 = vadd.f32 %v1083_v35, %v383_v36 }
  0x6e   : > { %v419_v47 = vmul.f32 0.5, %v403_v41 }
  0x71   : > { %v357_v43 = vpop.permute.xlu2 %356 }
  0x72   : > { %v393_v55 = vmul.f32 %v1078_v34, %v357_v43 }
  0x74   : > { %v1101_v2 = vadd.f32 %v1083_v35, %v393_v55 }
  0x76   : > { %v429_v12 = vmul.f32 0.5, %v1101_v2 }
  0x79   : > { %v317_v57 = vpop.permute.xlu2 %316 }
  0x7a   : > { %v385_v61 = vmul.f32 %v1078_v34, %v317_v57 }
  0x7c   : > { %v1105_v7 = vadd.f32 %v1083_v35, %v385_v61 }
  0x7e   : > { %v421_v17 = vmul.f32 0.5, %v1105_v7 }
  0x81   : > { %v342_v37 = vpop.permute.xlu0 %341  ;;  %v372_v23 = vpop.permute.xlu2 %371 }
  0x82   : > { %v390_v38 = vmul.f32 %v1078_v34, %v342_v37  ;;  %v302_v39 = vpop.permute.xlu1 %301 }
  0x83   : > { %v382_v40 = vmul.f32 %v1078_v34, %v302_v39 }
  0x84   : > { %v410_v42 = vadd.f32 %v1083_v35, %v390_v38 }
  0x85   : > { %v402_v44 = vadd.f32 %v1083_v35, %v382_v40 }
  0x86   : > { %v426_v45 = vmul.f32 0.5, %v410_v42 }
  0x87   : > { %v418_v46 = vmul.f32 0.5, %v402_v44 }
  0x88   : > { %880 = vtanh.f32 %v426_v45 }
  0x89   : > { %v347_v48 = vpop.permute.xlu0 %346  ;;  %882 = vtanh.f32 %v418_v46 }
  0x8a   : > { %v391_v49 = vmul.f32 %v1078_v34, %v347_v48  ;;  %v352_v50 = vpop.permute.xlu1 %351  ;;  %884 = vtanh.f32 %v419_v47  ;;  %v332_v47 = vpop.permute.xlu2 %331 }
  0x8b   : > { %v392_v51 = vmul.f32 %v1078_v34, %v352_v50 }
  0x8c   : > { %v411_v52 = vadd.f32 %v1083_v35, %v391_v49  ;;  %v396_v49 = vmul.f32 %v1078_v34, %v372_v23 }
  0x8d   : > { %v1095_v53 = vadd.f32 %v1083_v35, %v392_v51 }
  0x8e   : > { %v881_v54 = vpop.eup %880  ;;  %v427_v56 = vmul.f32 0.5, %v411_v52  ;;  %v1134_v57 = vadd.f32 %v1083_v35, %v396_v49  ;;  %v666_v49 = vld [vmem:[%s1272_s5 + $0x18] sm:$0xff] }
  0x8f   : > { %v428_v58 = vmul.f32 0.5, %v1095_v53  ;;  %v458_v59 = vmul.f32 0.5, %v881_v54  ;;  %v883_v60 = vpop.eup %882  ;;  %v388_v54 = vmul.f32 %v1078_v34, %v332_v47  ;;  %v668_v47 = vld [vmem:[%s1272_s5 + $0x28] sm:$0xff] }
  0x90   : > { %886 = vtanh.f32 %v427_v56  ;;  %v450_v63 = vmul.f32 0.5, %v883_v60  ;;  %v885_v1 = vpop.eup %884 }
  0x91   : > { %v312_v62 = vpop.permute.xlu0 %311  ;;  %v474_v0 = vadd.f32 0.5, %v458_v59  ;;  %888 = vtanh.f32 %v428_v58  ;;  %v451_v10 = vmul.f32 0.5, %v885_v1  ;;  %v1138_v61 = vadd.f32 %v1083_v35, %v388_v54  ;;  %v1204_v54 = vld [vmem:[%s1271_s4] ss:$0 sm:$0xff] }
  0x92   : > { %v384_v3 = vmul.f32 %v1078_v34, %v312_v62  ;;  %v362_v4 = vpop.permute.xlu1 %361  ;;  %v466_v5 = vadd.f32 0.5, %v450_v63  ;;  %v432_v1 = vmul.f32 0.5, %v1134_v57 }
  0x93   : > { %v490_v6 = vmul.f32 %v474_v0, %v410_v42  ;;  %v394_v14 = vmul.f32 %v1078_v34, %v362_v4  ;;  %v467_v19 = vadd.f32 0.5, %v451_v10  ;;  %v676_v10 = vld [vmem:[%s1272_s5 + $0x68] sm:$0xff] }
  0x94   : > { %v404_v8 = vadd.f32 %v1083_v35, %v384_v3  ;;  %v482_v9 = vmul.f32 %v466_v5, %v402_v44  ;;  %v677_v5 = vld [vmem:[%s1272_s5 + $0x70] sm:$0xff] }
  0x95   : > { %558 = vmatmul.f32.vlgmr.msra.gmra.mxu2 %v490_v6  ;;  %v1112_v21 = vadd.f32 %v1083_v35, %v394_v14  ;;  %v483_v28 = vmul.f32 %v467_v19, %v403_v41 }
  0x96   : > { %v887_v11 = vpop.eup %886  ;;  %v420_v13 = vmul.f32 0.5, %v404_v8  ;;  %534 = vmatmul.f32.vlgmr.msra.gmra.mxu0 %v482_v9 }
  0x97   : > { %v459_v15 = vmul.f32 0.5, %v887_v11  ;;  %v889_v16 = vpop.eup %888  ;;  %v430_v30 = vmul.f32 0.5, %v1112_v21 }
  0x98   : > { %890 = vtanh.f32 %v420_v13  ;;  %v460_v26 = vmul.f32 0.5, %v889_v16 }
  0x99   : > { %v367_v18 = vpop.permute.xlu0 %366  ;;  %v475_v20 = vadd.f32 0.5, %v459_v15  ;;  %892 = vtanh.f32 %v429_v12 }
  0x9a   : > { %v322_v22 = vpop.permute.xlu1 %321  ;;  %894 = vtanh.f32 %v421_v17  ;;  %v395_v31 = vmul.f32 %v1078_v34, %v367_v18  ;;  %v476_v33 = vadd.f32 0.5, %v460_v26  ;;  %v674_v18 = vld [vmem:[%s1272_s5 + $0x58] sm:$0xff] }
  0x9b   : > { %v386_v24 = vmul.f32 %v1078_v34, %v322_v22  ;;  %v491_v25 = vmul.f32 %v475_v20, %v411_v52  ;;  %896 = vtanh.f32 %v430_v30 }
  0x9c   : > { %v1122_v42 = vadd.f32 %v1083_v35, %v395_v31  ;;  %v492_v44 = vmul.f32 %v476_v33, %v1095_v53 }
  0x9d   : > { %v1116_v27 = vadd.f32 %v1083_v35, %v386_v24  ;;  %561 = vmatmul.f32.gmra.mxu2 %v491_v25  ;;  %v672_v24 = vld [vmem:[%s1272_s5 + $0x48] sm:$0xff] }
  0x9e   : > { %v891_v29 = vpop.eup %890  ;;  %537 = vmatmul.f32.gmra.mxu0 %v483_v28  ;;  %v431_v50 = vmul.f32 0.5, %v1122_v42 }
  0x9f   : > { %v452_v32 = vmul.f32 0.5, %v891_v29  ;;  %v893_v36 = vpop.eup %892  ;;  %v422_v37 = vmul.f32 0.5, %v1116_v27 }
  0xa0   : > { %v895_v40 = vpop.eup %894  ;;  %v461_v45 = vmul.f32 0.5, %v893_v36 }
  0xa1   : > { %v327_v38 = vpop.permute.xlu0 %326  ;;  %v468_v39 = vadd.f32 0.5, %v452_v32  ;;  %898 = vtanh.f32 %v422_v37  ;;  %v453_v48 = vmul.f32 0.5, %v895_v40  ;;  %v897_v52 = vpop.eup %896 }
  0xa2   : > { %v387_v41 = vmul.f32 %v1078_v34, %v327_v38  ;;  %v477_v51 = vadd.f32 0.5, %v461_v45  ;;  %900 = vtanh.f32 %v431_v50  ;;  %v377_v58 = vpop.permute.xlu1 %376  ;;  %v462_v60 = vmul.f32 0.5, %v897_v52  ;;  %v670_v45 = vld [vmem:[%s1272_s5 + $0x38] sm:$0xff]  ;;  %v665_v50 = vld [vmem:[%s1272_s5 + $0x10] sm:$0xff]  ;;  %v663_v52 = vld [vmem:[%s1272_s5] sm:$0xff] }
  0xa3   : > { %v484_v43 = vmul.f32 %v468_v39, %v404_v8  ;;  %v469_v53 = vadd.f32 0.5, %v453_v48  ;;  %v397_v3 = vmul.f32 %v1078_v34, %v377_v58  ;;  %v424_v8 = vmul.f32 0.5, %v1138_v61  ;;  %v667_v48 = vld [vmem:[%s1272_s5 + $0x20] sm:$0xff] }
  0xa4   : > { %v1127_v46 = vadd.f32 %v1083_v35, %v387_v41  ;;  %v493_v59 = vmul.f32 %v477_v51, %v1101_v2  ;;  %v478_v4 = vadd.f32 0.5, %v462_v60  ;;  %v678_v2 = vld [vmem:[%s1272_s5 + $0x78] sm:$0xff]  ;;  %v664_v51 = vld [vmem:[%s1272_s5 + $0x8] sm:$0xff] }
  0xa5   : > { %564 = vmatmul.f32.gmra.mxu2 %v492_v44  ;;  %v485_v63 = vmul.f32 %v469_v53, %v1105_v7  ;;  %683 = vmatpush.msra.mxu1 %v678_v2  ;;  %v417_v12 = vadd.f32 %v1083_v35, %v397_v3  ;;  %v671_v44 = vld [vmem:[%s1272_s5 + $0x40] sm:$0xff] }
  0xa6   : > { %540 = vmatmul.f32.gmra.mxu0 %v484_v43  ;;  %v423_v55 = vmul.f32 0.5, %v1127_v46  ;;  %848 = vmatpush.msra.mxu3 %v678_v2  ;;  %v494_v13 = vmul.f32 %v478_v4, %v1112_v21  ;;  %v673_v21 = vld [vmem:[%s1272_s5 + $0x50] sm:$0xff] }
  0xa7   : > { %v899_v56 = vpop.eup %898  ;;  %684 = vmatpush.msra.mxu1 %v677_v5  ;;  %v433_v19 = vmul.f32 0.5, %v417_v12 }
  0xa8   : > { %902 = vtanh.f32 %v423_v55  ;;  %v454_v0 = vmul.f32 0.5, %v899_v56  ;;  %v901_v6 = vpop.eup %900  ;;  %849 = vmatpush.msra.mxu3 %v677_v5 }
  0xa9   : > { %v337_v62 = vpop.permute.xlu0 %336  ;;  %904 = vtanh.f32 %v432_v1  ;;  %v463_v14 = vmul.f32 0.5, %v901_v6  ;;  %685 = vmatpush.msra.mxu1 %v676_v10 }
  0xaa   : > { %v389_v7 = vmul.f32 %v1078_v34, %v337_v62  ;;  %v470_v9 = vadd.f32 0.5, %v454_v0  ;;  %v675_v34 = vld [vmem:[%s1272_s5 + $0x60] sm:$0xff]  ;;  %906 = vtanh.f32 %v424_v8  ;;  %850 = vmatpush.msra.mxu3 %v676_v10 }
  0xab   : > { %686 = vmatpush.msra.mxu1 %v675_v34  ;;  %v479_v20 = vadd.f32 0.5, %v463_v14  ;;  %908 = vtanh.f32 %v433_v19 }
  0xac   : > { %v409_v15 = vadd.f32 %v1083_v35, %v389_v7  ;;  %v486_v16 = vmul.f32 %v470_v9, %v1116_v27  ;;  %851 = vmatpush.msra.mxu3 %v675_v34 }
  0xad   : > { %567 = vmatmul.f32.gmra.mxu2 %v493_v59  ;;  %687 = vmatpush.msra.mxu1 %v674_v18  ;;  %v495_v26 = vmul.f32 %v479_v20, %v1122_v42 }
  0xae   : > { %543 = vmatmul.f32.gmra.mxu0 %v485_v63  ;;  %v903_v11 = vpop.eup %902  ;;  %v425_v22 = vmul.f32 0.5, %v409_v15  ;;  %852 = vmatpush.msra.mxu3 %v674_v18 }
  0xaf   : > { %v455_v17 = vmul.f32 0.5, %v903_v11  ;;  %v905_v35 = vpop.eup %904  ;;  %688 = vmatpush.msra.mxu1 %v673_v21 }
  0xb0   : > { %v907_v25 = vpop.eup %906  ;;  %853 = vmatpush.msra.mxu3 %v673_v21  ;;  %v464_v27 = vmul.f32 0.5, %v905_v35  ;;  %910 = vtanh.f32 %v425_v22 }
  0xb1   : > { %v471_v23 = vadd.f32 0.5, %v455_v17  ;;  %689 = vmatpush.msra.mxu1 %v672_v24  ;;  %v456_v29 = vmul.f32 0.5, %v907_v25  ;;  %v909_v31 = vpop.eup %908 }
  0xb2   : > { %854 = vmatpush.msra.mxu3 %v672_v24  ;;  %v480_v30 = vadd.f32 0.5, %v464_v27  ;;  %v465_v37 = vmul.f32 0.5, %v909_v31 }
  0xb3   : > { %v487_v28 = vmul.f32 %v471_v23, %v1127_v46  ;;  %v472_v32 = vadd.f32 0.5, %v456_v29  ;;  %690 = vmatpush.msra.mxu1 %v671_v44  ;;  %v669_v46 = vld [vmem:[%s1272_s5 + $0x30] sm:$0xff] }
  0xb4   : > { %v496_v36 = vmul.f32 %v480_v30, %v1134_v57  ;;  %v481_v40 = vadd.f32 0.5, %v465_v37  ;;  %855 = vmatpush.msra.mxu3 %v671_v44 }
  0xb5   : > { %570 = vmatmul.f32.gmra.mxu2 %v494_v13  ;;  %v488_v38 = vmul.f32 %v472_v32, %v1138_v61  ;;  %691 = vmatpush.msra.mxu1 %v670_v45 }
  0xb6   : > { %546 = vmatmul.f32.gmra.mxu0 %v486_v16  ;;  %v911_v33 = vpop.eup %910  ;;  %v497_v41 = vmul.f32 %v481_v40, %v417_v12  ;;  %856 = vmatpush.msra.mxu3 %v670_v45 }
  0xb7   : > { %v457_v39 = vmul.f32 0.5, %v911_v33  ;;  %692 = vmatpush.msra.mxu1 %v669_v46 }
  0xb8   : > { %857 = vmatpush.msra.mxu3 %v669_v46 }
  0xb9   : > { %v473_v42 = vadd.f32 0.5, %v457_v39  ;;  %693 = vmatpush.msra.mxu1 %v668_v47 }
  0xba   : > { %858 = vmatpush.msra.mxu3 %v668_v47 }
  0xbb   : > { %v489_v43 = vmul.f32 %v473_v42, %v409_v15  ;;  %694 = vmatpush.msra.mxu1 %v667_v48 }
  0xbc   : > { %859 = vmatpush.msra.mxu3 %v667_v48 }
  0xbd   : > { %573 = vmatmul.f32.gmra.mxu2 %v495_v26  ;;  %695 = vmatpush.msra.mxu1 %v666_v49 }
  0xbe   : > { %549 = vmatmul.f32.gmra.mxu0 %v487_v28  ;;  %860 = vmatpush.msra.mxu3 %v666_v49 }
  0xbf   : > { %696 = vmatpush.msra.mxu1 %v665_v50 }
  0xc0   : > { %861 = vmatpush.msra.mxu3 %v665_v50 }
  0xc1   : > { %697 = vmatpush.msra.mxu1 %v664_v51 }
  0xc2   : > { %862 = vmatpush.msra.mxu3 %v664_v51 }
  0xc3   : > { %698 = vmatpush.msra.mxu1 %v663_v52 }
  0xc4   : > { %863 = vmatpush.msra.mxu3 %v663_v52 }
  0xc5   : > { %576 = vmatmul.f32.gmra.mxu2 %v496_v36 }
  0xc6   : > { %552 = vmatmul.f32.gmra.mxu0 %v488_v38 }
  0xcd   : > { %579 = vmatmul.f32.gmra.mxu2 %v497_v41 }
  0xce   : > { %555 = vmatmul.f32.gmra.mxu0 %v489_v43 }
 0x113   : > { %v535_v55 = vpop.f32.mrf.mxu0 }
 0x114   : > { %v536_v53 = vadd.f32 %v1204_v54, %v535_v55 }
 0x116   : > { %v583_v56 = vmul.f32 0.5, %v536_v53 }
 0x118   : > { %v559_v57 = vpop.f32.mrf.mxu2  ;;  %912 = vtanh.f32 %v583_v56 }
 0x119   : > { %v560_v58 = vadd.f32 %v1204_v54, %v559_v57 }
 0x11b   : > { %v591_v59 = vmul.f32 0.5, %v560_v58  ;;  %v538_v60 = vpop.f32.mrf.mxu0 }
 0x11c   : > { %v539_v61 = vadd.f32 %v1204_v54, %v538_v60 }
 0x11d   : > { %914 = vtanh.f32 %v591_v59 }
 0x11e   : > { %v913_v62 = vpop.eup %912  ;;  %v584_v63 = vmul.f32 0.5, %v539_v61 }
 0x11f   : > { %v615_v1 = vmul.f32 0.5, %v913_v62 }
 0x120   : > { %v562_v0 = vpop.f32.mrf.mxu2  ;;  %916 = vtanh.f32 %v584_v63 }
 0x121   : > { %v563_v3 = vadd.f32 %v1204_v54, %v562_v0  ;;  %v631_v4 = vadd.f32 0.5, %v615_v1 }
 0x123   : > { %v915_v2 = vpop.eup %914  ;;  %v592_v5 = vmul.f32 0.5, %v563_v3  ;;  %v541_v6 = vpop.f32.mrf.mxu0  ;;  %v647_v8 = vmul.f32 %v631_v4, %v536_v53 }
 0x124   : > { %v623_v7 = vmul.f32 0.5, %v915_v2  ;;  %v542_v9 = vadd.f32 %v1204_v54, %v541_v6 }
 0x125   : > { %918 = vtanh.f32 %v592_v5  ;;  %699 = vmatmul.f32.vlgmr.msra.gmra.mxu1 %v647_v8 }
 0x126   : > { %v639_v10 = vadd.f32 0.5, %v623_v7  ;;  %v917_v11 = vpop.eup %916  ;;  %v585_v12 = vmul.f32 0.5, %v542_v9 }
 0x127   : > { %v616_v34 = vmul.f32 0.5, %v917_v11 }
 0x128   : > { %v565_v13 = vpop.f32.mrf.mxu2  ;;  %v655_v14 = vmul.f32 %v639_v10, %v560_v58  ;;  %920 = vtanh.f32 %v585_v12 }
 0x129   : > { %v566_v15 = vadd.f32 %v1204_v54, %v565_v13  ;;  %v632_v16 = vadd.f32 0.5, %v616_v34 }
 0x12a   : > { %723 = vmatmul.f32.vlgmr.msra.gmra.mxu3 %v655_v14 }
 0x12b   : > { %v919_v17 = vpop.eup %918  ;;  %v593_v18 = vmul.f32 0.5, %v566_v15  ;;  %v544_v19 = vpop.f32.mrf.mxu0  ;;  %v648_v20 = vmul.f32 %v632_v16, %v539_v61 }
 0x12c   : > { %v624_v21 = vmul.f32 0.5, %v919_v17  ;;  %v545_v35 = vadd.f32 %v1204_v54, %v544_v19 }
 0x12d   : > { %922 = vtanh.f32 %v593_v18  ;;  %702 = vmatmul.f32.gmra.mxu1 %v648_v20 }
 0x12e   : > { %v640_v22 = vadd.f32 0.5, %v624_v21  ;;  %v921_v23 = vpop.eup %920  ;;  %v586_v24 = vmul.f32 0.5, %v545_v35 }
 0x12f   : > { %v617_v27 = vmul.f32 0.5, %v921_v23 }
 0x130   : > { %v568_v25 = vpop.f32.mrf.mxu2  ;;  %v656_v26 = vmul.f32 %v640_v22, %v563_v3  ;;  %924 = vtanh.f32 %v586_v24 }
 0x131   : > { %v569_v28 = vadd.f32 %v1204_v54, %v568_v25  ;;  %v633_v29 = vadd.f32 0.5, %v617_v27 }
 0x132   : > { %726 = vmatmul.f32.gmra.mxu3 %v656_v26 }
 0x133   : > { %v923_v30 = vpop.eup %922  ;;  %v594_v31 = vmul.f32 0.5, %v569_v28  ;;  %v547_v32 = vpop.f32.mrf.mxu0  ;;  %v649_v33 = vmul.f32 %v633_v29, %v542_v9 }
 0x134   : > { %v625_v36 = vmul.f32 0.5, %v923_v30  ;;  %v548_v37 = vadd.f32 %v1204_v54, %v547_v32 }
 0x135   : > { %926 = vtanh.f32 %v594_v31  ;;  %705 = vmatmul.f32.gmra.mxu1 %v649_v33 }
 0x136   : > { %v641_v38 = vadd.f32 0.5, %v625_v36  ;;  %v925_v39 = vpop.eup %924  ;;  %v587_v40 = vmul.f32 0.5, %v548_v37 }
 0x137   : > { %v618_v43 = vmul.f32 0.5, %v925_v39 }
 0x138   : > { %v571_v42 = vpop.f32.mrf.mxu2  ;;  %v657_v41 = vmul.f32 %v641_v38, %v566_v15  ;;  %928 = vtanh.f32 %v587_v40  ;;  %v879_v38 = vld [vmem:[%s1273_s6] ss:$0 sm:$0xff] }
 0x139   : > { %v572_v44 = vadd.f32 %v1204_v54, %v571_v42  ;;  %v634_v45 = vadd.f32 0.5, %v618_v43 }
 0x13a   : > { %729 = vmatmul.f32.gmra.mxu3 %v657_v41 }
 0x13b   : > { %v927_v46 = vpop.eup %926  ;;  %v595_v47 = vmul.f32 0.5, %v572_v44  ;;  %v550_v48 = vpop.f32.mrf.mxu0  ;;  %v650_v49 = vmul.f32 %v634_v45, %v545_v35 }
 0x13c   : > { %v626_v50 = vmul.f32 0.5, %v927_v46  ;;  %v551_v51 = vadd.f32 %v1204_v54, %v550_v48 }
 0x13d   : > { %930 = vtanh.f32 %v595_v47  ;;  %708 = vmatmul.f32.gmra.mxu1 %v650_v49 }
 0x13e   : > { %v642_v52 = vadd.f32 0.5, %v626_v50  ;;  %v929_v55 = vpop.eup %928  ;;  %v588_v53 = vmul.f32 0.5, %v551_v51 }
 0x13f   : > { %v619_v58 = vmul.f32 0.5, %v929_v55 }
 0x140   : > { %v574_v56 = vpop.f32.mrf.mxu2  ;;  %v658_v57 = vmul.f32 %v642_v52, %v569_v28  ;;  %932 = vtanh.f32 %v588_v53 }
 0x141   : > { %v575_v59 = vadd.f32 %v1204_v54, %v574_v56  ;;  %v635_v60 = vadd.f32 0.5, %v619_v58 }
 0x142   : > { %732 = vmatmul.f32.gmra.mxu3 %v658_v57 }
 0x143   : > { %v931_v61 = vpop.eup %930  ;;  %v596_v62 = vmul.f32 0.5, %v575_v59  ;;  %v553_v63 = vpop.f32.mrf.mxu0  ;;  %v651_v0 = vmul.f32 %v635_v60, %v548_v37 }
 0x144   : > { %v627_v1 = vmul.f32 0.5, %v931_v61  ;;  %v554_v3 = vadd.f32 %v1204_v54, %v553_v63 }
 0x145   : > { %934 = vtanh.f32 %v596_v62  ;;  %711 = vmatmul.f32.gmra.mxu1 %v651_v0 }
 0x146   : > { %v643_v4 = vadd.f32 0.5, %v627_v1  ;;  %v933_v2 = vpop.eup %932  ;;  %v589_v5 = vmul.f32 0.5, %v554_v3 }
 0x147   : > { %v620_v7 = vmul.f32 0.5, %v933_v2 }
 0x148   : > { %v577_v6 = vpop.f32.mrf.mxu2  ;;  %v659_v8 = vmul.f32 %v643_v4, %v572_v44  ;;  %936 = vtanh.f32 %v589_v5 }
 0x149   : > { %v578_v9 = vadd.f32 %v1204_v54, %v577_v6  ;;  %v636_v10 = vadd.f32 0.5, %v620_v7 }
 0x14a   : > { %735 = vmatmul.f32.gmra.mxu3 %v659_v8 }
 0x14b   : > { %v935_v11 = vpop.eup %934  ;;  %v597_v12 = vmul.f32 0.5, %v578_v9  ;;  %v556_v13 = vpop.f32.mrf.mxu0  ;;  %v652_v14 = vmul.f32 %v636_v10, %v551_v51 }
 0x14c   : > { %v628_v34 = vmul.f32 0.5, %v935_v11  ;;  %v557_v15 = vadd.f32 %v1204_v54, %v556_v13 }
 0x14d   : > { %938 = vtanh.f32 %v597_v12  ;;  %714 = vmatmul.f32.gmra.mxu1 %v652_v14 }
 0x14e   : > { %v644_v16 = vadd.f32 0.5, %v628_v34  ;;  %v937_v17 = vpop.eup %936  ;;  %v590_v18 = vmul.f32 0.5, %v557_v15 }
 0x14f   : > { %v621_v21 = vmul.f32 0.5, %v937_v17 }
 0x150   : > { %v580_v19 = vpop.f32.mrf.mxu2  ;;  %v660_v20 = vmul.f32 %v644_v16, %v575_v59  ;;  %940 = vtanh.f32 %v590_v18 }
 0x151   : > { %v581_v35 = vadd.f32 %v1204_v54, %v580_v19  ;;  %v637_v22 = vadd.f32 0.5, %v621_v21 }
 0x152   : > { %738 = vmatmul.f32.gmra.mxu3 %v660_v20 }
 0x153   : > { %v939_v23 = vpop.eup %938  ;;  %v598_v24 = vmul.f32 0.5, %v581_v35  ;;  %v653_v25 = vmul.f32 %v637_v22, %v554_v3 }
 0x154   : > { %v629_v26 = vmul.f32 0.5, %v939_v23 }
 0x155   : > { %942 = vtanh.f32 %v598_v24  ;;  %717 = vmatmul.f32.gmra.mxu1 %v653_v25 }
 0x156   : > { %v645_v27 = vadd.f32 0.5, %v629_v26  ;;  %v941_v28 = vpop.eup %940 }
 0x157   : > { %v622_v30 = vmul.f32 0.5, %v941_v28 }
 0x158   : > { %v661_v29 = vmul.f32 %v645_v27, %v578_v9 }
 0x159   : > { %v638_v31 = vadd.f32 0.5, %v622_v30 }
 0x15a   : > { %741 = vmatmul.f32.gmra.mxu3 %v661_v29 }
 0x15b   : > { %v943_v32 = vpop.eup %942  ;;  %v654_v33 = vmul.f32 %v638_v31, %v557_v15 }
 0x15c   : > { %v630_v36 = vmul.f32 0.5, %v943_v32 }
 0x15d   : > { %720 = vmatmul.f32.gmra.mxu1 %v654_v33 }
 0x15e   : > { %v646_v54 = vadd.f32 0.5, %v630_v36 }
 0x160   : > { %v662_v37 = vmul.f32 %v646_v54, %v581_v35 }
 0x162   : > { %744 = vmatmul.f32.gmra.mxu3 %v662_v37 }
 0x1a2   : > { %v700_v39 = vpop.f32.mrf.mxu1 }
 0x1a3   : > { %v701_v40 = vadd.f32 %v879_v38, %v700_v39 }
 0x1a5   : > { %749 = vst.msk [vmem:[%s1230_s22] sm:$0xff] %vm748_vm0, %v701_v40 }
 0x1aa   : > { %v703_v42 = vpop.f32.mrf.mxu1 }
 0x1ab   : > { %v704_v41 = vadd.f32 %v879_v38, %v703_v42 }
 0x1ad   : > { %v724_v43 = vpop.f32.mrf.mxu3  ;;  %750 = vst.msk [vmem:[%s1230_s22 + $0x8] sm:$0xff] %vm748_vm0, %v704_v41 }
 0x1ae   : > { %v725_v44 = vadd.f32 %v879_v38, %v724_v43 }
 0x1b0   : > { %757 = vst.msk [vmem:[%s1230_s22 + $0x40] sm:$0xff] %vm748_vm0, %v725_v44 }
 0x1b2   : > { %v706_v45 = vpop.f32.mrf.mxu1 }
 0x1b3   : > { %v707_v46 = vadd.f32 %v879_v38, %v706_v45 }
 0x1b5   : > { %v727_v47 = vpop.f32.mrf.mxu3  ;;  %751 = vst.msk [vmem:[%s1230_s22 + $0x10] sm:$0xff] %vm748_vm0, %v707_v46 }
 0x1b6   : > { %v728_v48 = vadd.f32 %v879_v38, %v727_v47 }
 0x1b8   : > { %758 = vst.msk [vmem:[%s1230_s22 + $0x48] sm:$0xff] %vm748_vm0, %v728_v48 }
 0x1ba   : > { %v709_v49 = vpop.f32.mrf.mxu1 }
 0x1bb   : > { %v710_v50 = vadd.f32 %v879_v38, %v709_v49 }
 0x1bd   : > { %v730_v51 = vpop.f32.mrf.mxu3  ;;  %752 = vst.msk [vmem:[%s1230_s22 + $0x18] sm:$0xff] %vm748_vm0, %v710_v50 }
 0x1be   : > { %v731_v52 = vadd.f32 %v879_v38, %v730_v51 }
 0x1c0   : > { %759 = vst.msk [vmem:[%s1230_s22 + $0x50] sm:$0xff] %vm748_vm0, %v731_v52 }
 0x1c2   : > { %v712_v55 = vpop.f32.mrf.mxu1 }
 0x1c3   : > { %v713_v53 = vadd.f32 %v879_v38, %v712_v55 }
 0x1c5   : > { %v733_v56 = vpop.f32.mrf.mxu3  ;;  %753 = vst.msk [vmem:[%s1230_s22 + $0x20] sm:$0xff] %vm748_vm0, %v713_v53 }
 0x1c6   : > { %v734_v57 = vadd.f32 %v879_v38, %v733_v56 }
 0x1c8   : > { %760 = vst.msk [vmem:[%s1230_s22 + $0x58] sm:$0xff] %vm748_vm0, %v734_v57 }
 0x1ca   : > { %v715_v58 = vpop.f32.mrf.mxu1 }
 0x1cb   : > { %v716_v59 = vadd.f32 %v879_v38, %v715_v58 }
 0x1cd   : > { %v736_v60 = vpop.f32.mrf.mxu3  ;;  %754 = vst.msk [vmem:[%s1230_s22 + $0x28] sm:$0xff] %vm748_vm0, %v716_v59 }
 0x1ce   : > { %v737_v61 = vadd.f32 %v879_v38, %v736_v60 }
 0x1d0   : > { %761 = vst.msk [vmem:[%s1230_s22 + $0x60] sm:$0xff] %vm748_vm0, %v737_v61 }
 0x1d2   : > { %v718_v62 = vpop.f32.mrf.mxu1 }
 0x1d3   : > { %v719_v63 = vadd.f32 %v879_v38, %v718_v62 }
 0x1d5   : > { %v739_v0 = vpop.f32.mrf.mxu3  ;;  %755 = vst.msk [vmem:[%s1230_s22 + $0x30] sm:$0xff] %vm748_vm0, %v719_v63 }
 0x1d6   : > { %v740_v1 = vadd.f32 %v879_v38, %v739_v0 }
 0x1d8   : > { %762 = vst.msk [vmem:[%s1230_s22 + $0x68] sm:$0xff] %vm748_vm0, %v740_v1 }
 0x1da   : > { %v721_v3 = vpop.f32.mrf.mxu1 }
 0x1db   : > { %v722_v4 = vadd.f32 %v879_v38, %v721_v3 }
 0x1dd   : > { %v742_v2 = vpop.f32.mrf.mxu3  ;;  %756 = vst.msk [vmem:[%s1230_s22 + $0x38] sm:$0xff] %vm748_vm0, %v722_v4 }
 0x1de   : > { %v743_v5 = vadd.f32 %v879_v38, %v742_v2 }
 0x1e0   : > { %763 = vst.msk [vmem:[%s1230_s22 + $0x70] sm:$0xff] %vm748_vm0, %v743_v5 }
 0x1e5   : > { %v745_v6 = vpop.f32.mrf.mxu3 }
 0x1e6   : > { %v746_v8 = vadd.f32 %v879_v38, %v745_v6 }
 0x1e8   : > { %764 = vst.msk [vmem:[%s1230_s22 + $0x78] sm:$0xff] %vm748_vm0, %v746_v8 }
 0x1e9 PF: > { %s17_s24 = sadd.s32 1, %s950_s24  }
 0x1ea   : > { %p14_p4 = scmp.ge.s32.totalorder %s17_s24, 4  }
 0x1ec   :  { %16 = sbr.rel (!%p14_p4) target bundleno = 1 (0x1), region = 78 }

</bundles_post_ra>
